<compile_context>
chip_gen: v5e
topology: v5e:2x2
jax: 0.10.0
libtpu: 0.0.40
codegen_flags: <defaults>
</compile_context>

<pallas_src>
import functools

import jax
import jax.numpy as jnp
from jax.experimental import pallas as pl
from jax.experimental.pallas import tpu as pltpu

EPS = 1e-5


# --------------------------------------------------------------------------
# Per-generation VMEM budgets.
# --------------------------------------------------------------------------
@functools.lru_cache(maxsize=None)
def _physical_vmem_bytes():
    """Per-TensorCore physical VMEM; conservative (v7x = 64 MiB) on failure."""
    try:
        cap = int(getattr(pltpu.get_tpu_info(), "vmem_capacity_bytes", 0) or 0)
        if cap > 0:
            return cap
    except Exception:
        pass
    try:
        kind = jax.devices()[0].device_kind.lower()
        if "v7" in kind or "7x" in kind:
            return 64 << 20
        return 128 << 20
    except Exception:
        return 64 << 20


def _vmem_limit_bytes():
    # v7x: 48 MiB of its 64 MiB physical; v5e/v6e: 96 MiB of 128 MiB physical.
    return int(min((_physical_vmem_bytes() * 3) // 4, 96 << 20))


def _pick_lane_tile(S, C, itemsize, max_block_bytes):
    """Lane tile: multiple of 128 (masked boundary) or the full extent S."""
    per_lane = max(C * itemsize, 1)
    max_ts = max(128, ((max_block_bytes // per_lane) // 128) * 128)
    if S <= max_ts:
        return S              # full extent: always a legal block dimension
    return max_ts             # multiple of 128, boundary handled by masking


# --------------------------------------------------------------------------
# Fused path: whole x resident in VMEM, single kernel, 1 read + 1 write.
# --------------------------------------------------------------------------
def _bn_relu_fused_kernel(x_ref, gb_ref, o_ref):
    n, c, s = x_ref.shape
    inv_count = 1.0 / float(n * s)
    x = x_ref[...].astype(jnp.float32)                                  # (N, C, S)
    # Per-channel mean (lane reduce, then leading-axis sum).
    mean = jnp.sum(jnp.sum(x, axis=2, keepdims=True),
                   axis=0, keepdims=True) * inv_count                   # (1, C, 1)
    d = x - mean
    # Centered variance: numerically stable (no E[x^2]-mean^2 cancellation).
    var = jnp.sum(jnp.sum(d * d, axis=2, keepdims=True),
                  axis=0, keepdims=True) * inv_count                    # (1, C, 1)
    inv_std = jax.lax.rsqrt(jnp.maximum(var, 0.0) + EPS)
    gb = gb_ref[...].astype(jnp.float32)                                # (C, 2)
    gamma = gb[:, 0:1][None]                                            # (1, C, 1)
    beta = gb[:, 1:2][None]                                             # (1, C, 1)
    o_ref[...] = jnp.maximum(d * (gamma * inv_std) + beta, 0.0).astype(o_ref.dtype)


# --------------------------------------------------------------------------
# Fallback two-pass path (x too large to keep resident).
# --------------------------------------------------------------------------
def _bn_stats_kernel(x_ref, ps_ref, *, s_total, ts):
    """Accumulate per-(sample, channel) sum / sum-of-squares over lane tiles."""
    t = pl.program_id(1)

    @pl.when(t == 0)
    def _init():
        ps_ref[...] = jnp.zeros_like(ps_ref)

    x = x_ref[...].astype(jnp.float32)                                  # (1, C, ts)
    if s_total % ts != 0:
        lane = t * ts + jax.lax.broadcasted_iota(jnp.int32, x.shape, 2)
        x = jnp.where(lane < s_total, x, 0.0)
    s = jnp.sum(x, axis=2, keepdims=True)                               # (1, C, 1)
    ss = jnp.sum(x * x, axis=2, keepdims=True)                          # (1, C, 1)
    ps_ref[...] += jnp.concatenate([s, ss], axis=2)                     # (1, C, 2)


def _bn_apply_kernel(x_ref, sc_ref, o_ref):
    """y = max(x * scale + shift, 0) with packed per-channel (C, 2) affine."""
    x = x_ref[...].astype(jnp.float32)                                  # (1, C, ts)
    sc = sc_ref[...]                                                    # (C, 2)
    scale = sc[:, 0:1][None]                                            # (1, C, 1)
    shift = sc[:, 1:2][None]                                            # (1, C, 1)
    o_ref[...] = jnp.maximum(x * scale + shift, 0.0).astype(o_ref.dtype)


# --------------------------------------------------------------------------
# Wrapper.
# --------------------------------------------------------------------------
def batchnorm_relu_nchw(x_nchw, gamma, beta, *,
                        _force_two_pass=False, _force_block_bytes=None):
    N, C, H, W = x_nchw.shape
    S = H * W
    x3 = x_nchw.reshape(N, C, S)                       # contiguous merge: free
    gb = jnp.stack([gamma.astype(jnp.float32),
                    beta.astype(jnp.float32)], axis=1)  # packed (C, 2)

    vmem_limit = _vmem_limit_bytes()
    resident_cap = vmem_limit // 6                      # headroom for in+out+temps
    x_f32_bytes = N * C * S * 4
    itemsize = x3.dtype.itemsize

    # ---------------- fused resident path ----------------
    if (not _force_two_pass) and x_f32_bytes <= resident_cap:
        ce = pl.CostEstimate(
            flops=int(8 * N * C * S),
            transcendentals=int(C),
            bytes_accessed=int(2 * N * C * S * itemsize + gb.size * 4))
        y3 = pl.pallas_call(
            _bn_relu_fused_kernel,
            out_shape=jax.ShapeDtypeStruct((N, C, S), x_nchw.dtype),
            compiler_params=pltpu.CompilerParams(vmem_limit_bytes=vmem_limit),
            cost_estimate=ce,
        )(x3, gb)
        return y3.reshape(N, C, H, W)

    # ---------------- fallback two-pass path ----------------
    max_block = _force_block_bytes or min(4 << 20, vmem_limit // 8)
    ts = _pick_lane_tile(S, C, itemsize, max_block)
    nt = pl.cdiv(S, ts)
    grid = (N, nt)

    # Pass 1: per-(sample, channel) partial stats; row axis "parallel" so v7x
    # can split it across both TensorCores, lane axis "arbitrary" (accumulator).
    ps = pl.pallas_call(
        functools.partial(_bn_stats_kernel, s_total=S, ts=ts),
        out_shape=jax.ShapeDtypeStruct((N, C, 2), jnp.float32),
        grid=grid,
        in_specs=[pl.BlockSpec((1, C, ts), lambda n, t: (n, 0, t))],
        out_specs=pl.BlockSpec((1, C, 2), lambda n, t: (n, 0, 0)),
        compiler_params=pltpu.CompilerParams(
            dimension_semantics=("parallel", "arbitrary"),
            vmem_limit_bytes=vmem_limit),
    )(x3)

    # Tiny per-channel finalize in plain XLA (a few C-sized FLOPs).
    tot = jnp.sum(ps, axis=0)                              # (C, 2)
    inv_count = 1.0 / float(N * S)
    mean = tot[:, 0:1] * inv_count                         # (C, 1)
    ex2 = tot[:, 1:2] * inv_count                          # (C, 1)
    var = jnp.maximum(ex2 - mean * mean, 0.0)              # clamp: cancellation guard
    inv_std = jax.lax.rsqrt(var + EPS)
    scale = gb[:, 0:1] * inv_std
    shift = gb[:, 1:2] - mean * scale
    sc = jnp.concatenate([scale, shift], axis=1)           # packed (C, 2)

    # Pass 2: normalize + ReLU; fully parallel grid.
    ce = pl.CostEstimate(
        flops=int(3 * N * C * S),
        transcendentals=0,
        bytes_accessed=int(2 * N * C * S * itemsize + sc.size * 4))
    y3 = pl.pallas_call(
        _bn_apply_kernel,
        out_shape=jax.ShapeDtypeStruct((N, C, S), x_nchw.dtype),
        grid=grid,
        in_specs=[pl.BlockSpec((1, C, ts), lambda n, t: (n, 0, t)),
                  pl.BlockSpec((C, 2), lambda n, t: (0, 0))],
        out_specs=pl.BlockSpec((1, C, ts), lambda n, t: (n, 0, t)),
        compiler_params=pltpu.CompilerParams(
            dimension_semantics=("parallel", "parallel"),
            vmem_limit_bytes=vmem_limit),
        cost_estimate=ce,
    )(x3, sc)
    return y3.reshape(N, C, H, W)


def residual_block_forward(x_nchw, params):
    """ResidualBlock.forward: returns post_res(x) = ReLU(BatchNorm2d(x)).

    The pre_res conv path and the residual add in the reference module are dead
    compute (their result is overwritten before return), so conv1_*/bn1_*/
    conv2_* parameters are accepted but intentionally unused.
    """
    return batchnorm_relu_nchw(x_nchw, params["bn2_g"], params["bn2_b"])


def _reference_output(x_nchw, gamma, beta):
    # Pure-JAX reference: training-mode BatchNorm2d (batch stats, biased var) + ReLU.
    xf = x_nchw.astype(jnp.float32)
    mean = jnp.mean(xf, axis=(0, 2, 3), keepdims=True)
    var = jnp.mean((xf - mean) ** 2, axis=(0, 2, 3), keepdims=True)
    y = (xf - mean) * jax.lax.rsqrt(var + EPS)
    y = y * gamma.reshape(1, -1, 1, 1) + beta.reshape(1, -1, 1, 1)
    return jnp.maximum(y, 0.0)


if __name__ == "__main__":
    key = jax.random.PRNGKey(0)
    kx, k1, k2, k5, k6, kx2, k7, k8, kx3, k9, k10 = jax.random.split(key, 11)

    # ---- spec-sized case (fused resident path): (N, C, H, W) = (2, 4, 16, 16) ----
    N, C, H, W = 2, 4, 16, 16
    x = jax.random.normal(kx, (N, C, H, W), dtype=jnp.float32)
    params = {
        # pre_res parameters (same shapes as the PyTorch module; unused because
        # the module's return value does not depend on them):
        "conv1_w": 0.1 * jax.random.normal(k1, (C, C, 3, 3), dtype=jnp.float32),
        "conv1_b": jnp.zeros((C,), dtype=jnp.float32),
        "conv2_w": 0.1 * jax.random.normal(k2, (C, C, 3, 3), dtype=jnp.float32),
        "conv2_b": jnp.zeros((C,), dtype=jnp.float32),
        "bn1_g": jnp.ones((C,), dtype=jnp.float32),
        "bn1_b": jnp.zeros((C,), dtype=jnp.float32),
        # post_res BatchNorm (the only parameters the output depends on):
        "bn2_g": 1.0 + 0.1 * jax.random.normal(k5, (C,), dtype=jnp.float32),
        "bn2_b": 0.1 * jax.random.normal(k6, (C,), dtype=jnp.float32),
    }
    out = jax.block_until_ready(residual_block_forward(x, params))
    ref = _reference_output(x, params["bn2_g"], params["bn2_b"])
    assert out.shape == (N, C, H, W)
    assert float(jnp.max(jnp.abs(out - ref))) < 1e-3, "mismatch (fused, small)"

    # ---- medium case, still fused/resident ----
    N2, C2, H2, W2 = 4, 16, 64, 64
    x2 = jax.random.normal(kx2, (N2, C2, H2, W2), dtype=jnp.float32)
    g2 = 1.0 + 0.1 * jax.random.normal(k7, (C2,), dtype=jnp.float32)
    b2 = 0.1 * jax.random.normal(k8, (C2,), dtype=jnp.float32)
    out2 = jax.block_until_ready(batchnorm_relu_nchw(x2, g2, b2))
    ref2 = _reference_output(x2, g2, b2)
    assert float(jnp.max(jnp.abs(out2 - ref2))) < 1e-3, "mismatch (fused, medium)"

    # ---- force the two-pass fallback: multi row-block grid + lane masking
    #      (S = 144 is not a multiple of 128, small forced tile -> 2 lane tiles) ----
    N3, C3, H3, W3 = 3, 4, 12, 12
    x3 = jax.random.normal(kx3, (N3, C3, H3, W3), dtype=jnp.float32)
    g3 = 1.0 + 0.1 * jax.random.normal(k9, (C3,), dtype=jnp.float32)
    b3 = 0.1 * jax.random.normal(k10, (C3,), dtype=jnp.float32)
    out3 = jax.block_until_ready(
        batchnorm_relu_nchw(x3, g3, b3,
                            _force_two_pass=True, _force_block_bytes=2048))
    ref3 = _reference_output(x3, g3, b3)
    assert float(jnp.max(jnp.abs(out3 - ref3))) < 1e-3, "mismatch (two-pass)"

    print("KERNEL_OK")
</pallas_src>

<mosaic_0001>
module attributes {stable_mosaic.version = 11 : i64} {
  func.func @_bn_relu_fused_kernel(%arg0: memref<2x4x256xf32, #tpu.memory_space<vmem>>, %arg1: memref<4x2xf32, #tpu.memory_space<vmem>>, %arg2: memref<2x4x256xf32, #tpu.memory_space<vmem>>) attributes {dimension_semantics = [], scalar_prefetch = 0 : i64, scratch_operands = 0 : i64, tpu.core_type = #tpu.core_type<tc>} {
    %c0 = arith.constant 0 : index
    %c0_0 = arith.constant 0 : index
    %c0_1 = arith.constant 0 : index
    %0 = vector.load %arg0[%c0, %c0_0, %c0_1] : memref<2x4x256xf32, #tpu.memory_space<vmem>>, vector<2x4x256xf32>
    %cst = arith.constant dense<0.000000e+00> : vector<2x4xf32>
    %1 = vector.multi_reduction <add>, %0, %cst [2] : vector<2x4x256xf32> to vector<2x4xf32>
    %2 = vector.shape_cast %1 : vector<2x4xf32> to vector<2x4x1xf32>
    %cst_2 = arith.constant dense<0.000000e+00> : vector<4x1xf32>
    %3 = vector.multi_reduction <add>, %2, %cst_2 [0] : vector<2x4x1xf32> to vector<4x1xf32>
    %4 = vector.shape_cast %3 : vector<4x1xf32> to vector<1x4x1xf32>
    %cst_3 = arith.constant 0.001953125 : f32
    %5 = vector.broadcast %cst_3 : f32 to vector<1x4x1xf32>
    %6 = arith.mulf %4, %5 : vector<1x4x1xf32>
    %7 = vector.broadcast %6 : vector<1x4x1xf32> to vector<2x4x256xf32>
    %8 = arith.subf %0, %7 : vector<2x4x256xf32>
    %9 = arith.mulf %8, %8 : vector<2x4x256xf32>
    %cst_4 = arith.constant dense<0.000000e+00> : vector<2x4xf32>
    %10 = vector.multi_reduction <add>, %9, %cst_4 [2] : vector<2x4x256xf32> to vector<2x4xf32>
    %11 = vector.shape_cast %10 : vector<2x4xf32> to vector<2x4x1xf32>
    %cst_5 = arith.constant dense<0.000000e+00> : vector<4x1xf32>
    %12 = vector.multi_reduction <add>, %11, %cst_5 [0] : vector<2x4x1xf32> to vector<4x1xf32>
    %13 = vector.shape_cast %12 : vector<4x1xf32> to vector<1x4x1xf32>
    %cst_6 = arith.constant 0.001953125 : f32
    %14 = vector.broadcast %cst_6 : f32 to vector<1x4x1xf32>
    %15 = arith.mulf %13, %14 : vector<1x4x1xf32>
    %cst_7 = arith.constant 0.000000e+00 : f32
    %16 = vector.broadcast %cst_7 : f32 to vector<1x4x1xf32>
    %17 = arith.maximumf %15, %16 : vector<1x4x1xf32>
    %cst_8 = arith.constant 9.99999974E-6 : f32
    %18 = vector.broadcast %cst_8 : f32 to vector<1x4x1xf32>
    %19 = arith.addf %17, %18 : vector<1x4x1xf32>
    %20 = math.rsqrt %19 : vector<1x4x1xf32>
    %c0_9 = arith.constant 0 : index
    %c0_10 = arith.constant 0 : index
    %21 = vector.load %arg1[%c0_9, %c0_10] : memref<4x2xf32, #tpu.memory_space<vmem>>, vector<4x2xf32>
    %22 = vector.extract_strided_slice %21 {offsets = [0, 0], sizes = [4, 1], strides = [1, 1]} : vector<4x2xf32> to vector<4x1xf32>
    %23 = vector.shape_cast %22 : vector<4x1xf32> to vector<1x4x1xf32>
    %24 = vector.extract_strided_slice %21 {offsets = [0, 1], sizes = [4, 1], strides = [1, 1]} : vector<4x2xf32> to vector<4x1xf32>
    %25 = vector.shape_cast %24 : vector<4x1xf32> to vector<1x4x1xf32>
    %26 = arith.mulf %23, %20 : vector<1x4x1xf32>
    %27 = vector.broadcast %26 : vector<1x4x1xf32> to vector<2x4x256xf32>
    %28 = arith.mulf %8, %27 : vector<2x4x256xf32>
    %29 = vector.broadcast %25 : vector<1x4x1xf32> to vector<2x4x256xf32>
    %30 = arith.addf %28, %29 : vector<2x4x256xf32>
    %cst_11 = arith.constant 0.000000e+00 : f32
    %31 = vector.broadcast %cst_11 : f32 to vector<2x4x256xf32>
    %32 = arith.maximumf %30, %31 : vector<2x4x256xf32>
    %c0_12 = arith.constant 0 : index
    %c0_13 = arith.constant 0 : index
    %c0_14 = arith.constant 0 : index
    %33 = vector.load %arg2[%c0_12, %c0_13, %c0_14] : memref<2x4x256xf32, #tpu.memory_space<vmem>>, vector<2x4x256xf32>
    tpu.vector_store %arg2[%c0_12, %c0_13, %c0_14], %32 {strides = array<i32>} : memref<2x4x256xf32, #tpu.memory_space<vmem>>, vector<2x4x256xf32>,
    return
  }
}

</mosaic_0001>

<bundles_post_ra>
// kernel: tpu_custom_call.1
= control target key start
LH: loop header
LB: loop body
LE: loop exit
PB: predicated region body
PF: predicated region fallthrough
CT: control target
= control target key end

     0   :  { %7 = vsyncpa [#allocation3], 0  ;;  %s267_s0 = inlined_call_operand.hbm [shape: f32[2,4,256], index: 0, kind: input, shape index: {}]   ;;  %s268_s1 = inlined_call_operand.vmem [shape: f32[4,2], index: 1, kind: input, shape index: {}]   ;;  %s269_s2 = inlined_call_operand.hbm [shape: f32[2,4,256], index: 2, kind: output, shape index: {}]  }
   0x1   :  { %8 = vsyncpa [#allocation4], 0  ;;  %s13_s11 = sshll.u32 %s267_s0, 4  ;;  %s218_s12 = smov [#allocation2]   ;;  %s14_s11 = int_to_ptr.hbm [resolvable:$true] %s13_s11 }
   0x2   :  { %s15_s13 = sshll.u32 %s218_s12, 4  ;;  %s219_s14 = smov 128   ;;  %s16_s13 = int_to_ptr.vmem [resolvable:$true] %s15_s13 }
   0x3   :  { %s220_s15 = smov 8  }
   0x4   :  { %21 = dma.hbm_to_vmem [thread:$0]  %s14_s11, 256, %s16_s13, [#allocation3], %s219_s14, %s219_s14, %s220_s15  }
   0x5   :  { %214 = dma.done.wait [#allocation3], 256  }
   0x6   :  { %215 = vsyncadd [#allocation3], 4294967040  ;;  %v28_v0 = vld [vmem:[#allocation2] sm:$0xff]  ;;  %v29_v1 = vld [vmem:[#allocation2 + $0x8] sm:$0xff]  ;;  %vm43_vm0 = vcmask 1043456   ;;  %v222_v36 = vmov 0  }
   0x7   :  { %32 = vst [vmem:[#allocation1] ss:$2 sm:$0xff] %v28_v0  ;;  %v221_v13 = vmov 839922192   ;;  %161 = vset.pattern.permute.xlu2 %v222_v36  ;;  %v223_v38 = vmov 1   ;;  %s224_s17 = smov [#allocation5]  }
   0x8   :  { %36 = vst [vmem:[#allocation1 + $0x10] ss:$2 sm:$0xff] %v29_v1  ;;  %v60_v14 = vunpack.c.l.s4 %v221_v13  ;;  %163 = vset.pattern.permute.xlu0 %v223_v38  ;;  %v107_v52 = vld [vmem:[%s268_s1] sm:$0xf]  ;;  %s139_s18 = sshll.u32 %s224_s17, 4  ;;  %s141_s1 = sshll.u32 %s269_s2, 4  ;;  %s140_s18 = int_to_ptr.vmem [resolvable:$true] %s139_s18  ;;  %s142_s1 = int_to_ptr.hbm [resolvable:$true] %s141_s1 }
   0xa   :  { %v61_v18 = vunpack.c.0.s8 %v60_v14 }
   0xe   :  { %v33_v2 = vld.sshfl [vmem:[#allocation1] sm:$0xff pattern:$0x75316420]  ;;  %v34_v3 = vld.sshfl [vmem:[#allocation1 + $0x8] sm:$0xff pattern:$0x75316420] }
   0xf   :  { %v44_v4 = vsel %vm43_vm0, %v33_v2, 0.0  ;;  %v45_v5 = vsel %vm43_vm0, %v34_v3, 0.0  ;;  %v37_v7 = vld.sshfl [vmem:[#allocation1 + $0x10] sm:$0xff pattern:$0x75316420] }
  0x10   :  { %v46_v6 = vadd.f32 %v45_v5, %v44_v4  ;;  %v38_v8 = vld.sshfl [vmem:[#allocation1 + $0x18] sm:$0xff pattern:$0x75316420]  ;;  %v49_v9 = vsel %vm43_vm0, %v37_v7, 0.0 }
  0x11   :  { %v50_v10 = vsel %vm43_vm0, %v38_v8, 0.0 }
  0x12   :  { %47 = vadd.xlane.f32.xlu0 %v46_v6  ;;  %v51_v11 = vadd.f32 %v50_v10, %v49_v9 }
  0x1a   :  { %52 = vadd.xlane.f32.xlu0 %v51_v11 }
  0x85   :  { %v48_v12 = vpop.xlane.xlu0 %47 }
  0x86   :  { %v54_v16 = vsel %vm43_vm0, %v48_v12, 0.0 }
  0x8d   :  { %v53_v15 = vpop.xlane.xlu0 %52 }
  0x8e   :  { %v55_v17 = vsel %vm43_vm0, %v53_v15, 0.0 }
  0x8f   :  { %v56_v19 = vadd.f32 %v55_v17, %v54_v16 }
  0x91   :  { %v57_v20 = vmul.f32 0.001953125, %v56_v19 }
  0x93   :  { %v62_v21 = vperm.slane %v57_v20, %v61_v18 }
  0x95   :  { %v64_v22 = vsub.f32 %v28_v0, %v62_v21  ;;  %v65_v23 = vsub.f32 %v29_v1, %v62_v21 }
  0x97   :  { %v66_v24 = vmul.f32 %v64_v22, %v64_v22  ;;  %v67_v25 = vmul.f32 %v65_v23, %v65_v23 }
  0x99   :  { %70 = vst [vmem:[#allocation1] ss:$2 sm:$0xff] %v66_v24 }
  0x9a   :  { %74 = vst [vmem:[#allocation1 + $0x10] ss:$2 sm:$0xff] %v67_v25 }
  0xa0   :  { %v71_v26 = vld.sshfl [vmem:[#allocation1] sm:$0xff pattern:$0x75316420]  ;;  %v72_v27 = vld.sshfl [vmem:[#allocation1 + $0x8] sm:$0xff pattern:$0x75316420] }
  0xa1   :  { %v81_v28 = vsel %vm43_vm0, %v71_v26, 0.0  ;;  %v82_v29 = vsel %vm43_vm0, %v72_v27, 0.0  ;;  %v75_v31 = vld.sshfl [vmem:[#allocation1 + $0x10] sm:$0xff pattern:$0x75316420] }
  0xa2   :  { %v83_v30 = vadd.f32 %v82_v29, %v81_v28  ;;  %v76_v32 = vld.sshfl [vmem:[#allocation1 + $0x18] sm:$0xff pattern:$0x75316420]  ;;  %v86_v33 = vsel %vm43_vm0, %v75_v31, 0.0 }
  0xa3   :  { %v87_v34 = vsel %vm43_vm0, %v76_v32, 0.0 }
  0xa4   :  { %84 = vadd.xlane.f32.xlu1 %v83_v30  ;;  %v88_v35 = vadd.f32 %v87_v34, %v86_v33 }
  0xac   :  { %89 = vadd.xlane.f32.xlu1 %v88_v35 }
 0x117   :  { %v85_v37 = vpop.xlane.xlu1 %84 }
 0x118   :  { %v91_v40 = vsel %vm43_vm0, %v85_v37, 0.0 }
 0x11f   :  { %v90_v39 = vpop.xlane.xlu1 %89 }
 0x120   :  { %v92_v41 = vsel %vm43_vm0, %v90_v39, 0.0 }
 0x121   :  { %v93_v42 = vadd.f32 %v92_v41, %v91_v40 }
 0x123   :  { %v94_v43 = vmul.f32 0.001953125, %v93_v42 }
 0x125   :  { %v95_v44 = vmax.f32 %v94_v43, 0.0 }
 0x127   :  { %v96_v45 = vadd.f32 1e-05, %v95_v44 }
 0x129   :  { %164 = vrsqrt.f32 %v96_v45  ;;  %vm103_vm2 = vweird.f32 %v96_v45 }
 0x12f   :  { %v165_v46 = vpop.eup %164 }
 0x130   :  { %v98_v47 = vmul.f32 %v165_v46, %v96_v45  ;;  %vm104_vm1 = vweird.f32 %v165_v46 }
 0x131   :  { %vm105_vm3 = vmor %vm103_vm2, %vm104_vm1 }
 0x132   :  { %v99_v48 = vmul.f32 %v165_v46, %v98_v47 }
 0x134   :  { %v100_v49 = vmul.f32 0.5, %v99_v48 }
 0x136   :  { %v101_v50 = vsub.f32 1.5, %v100_v49 }
 0x138   :  { %v102_v51 = vmul.f32 %v165_v46, %v101_v50 }
 0x13a   :  { %v106_v53 = vsel %vm105_vm3, %v165_v46, %v102_v51 }
 0x13b   :  { %v108_v54 = vmul.f32 %v107_v52, %v106_v53 }
 0x13d   :  { %111 = vperm.xlu2 %161, %v108_v54  }
 0x145   :  { %162 = vset.pattern.permute.xlu2 %v223_v38 }
 0x146   :  { %122 = vperm.xlu2 %162, %v107_v52  }
 0x197   :  { %v112_v55 = vpop.permute.xlu2 %111 }
 0x198   :  { %v116_v56 = vperm.slane %v112_v55, %v61_v18 }
 0x19a   :  { %v118_v58 = vmul.f32 %v116_v56, %v64_v22  ;;  %v119_v59 = vmul.f32 %v116_v56, %v65_v23 }
 0x1a0   :  { %v123_v57 = vpop.permute.xlu2 %122 }
 0x1a1   :  { %v127_v60 = vperm.slane %v123_v57, %v61_v18 }
 0x1a3   :  { %v129_v61 = vadd.f32 %v127_v60, %v118_v58  ;;  %v130_v62 = vadd.f32 %v127_v60, %v119_v59 }
 0x1a5   :  { %v131_v63 = vmax.f32 %v129_v61, 0.0  ;;  %v132_v0 = vmax.f32 %v130_v62, 0.0 }
 0x1a7   :  { %133 = vst [vmem:[#allocation5] sm:$0xff] %v131_v63 }
 0x1a8   :  { %134 = vst [vmem:[#allocation5 + $0x8] sm:$0xff] %v132_v0 }
 0x1a9   :  { %147 = dma.vmem_to_hbm [thread:$0]  %s140_s18, 256, %s142_s1, [#allocation4], %s219_s14, %s219_s14, %s220_s15  }
 0x1aa   :  { %216 = dma.done.wait [#allocation4], 256  }
 0x1ab   :  { %217 = vsyncadd [#allocation4], 4294967040 }
 0x1ac   :  { %152 = vsyncpa [#allocation3], 1 }
 0x1ad   :  { %153 = vsyncpa [#allocation4], 1 }

</bundles_post_ra>
